<compile_context>
chip_gen: v6e
topology: v6e:2x2x1
jax: 0.10.0
libtpu: 0.0.40
codegen_flags: <defaults>
</compile_context>

<pallas_src>
import functools

import jax
import jax.numpy as jnp
from jax.experimental import pallas as pl
from jax.experimental.pallas import tpu as pltpu


def _round_up(a, b):
    return (a + b - 1) // b * b


def _choose_tile(n_pad, target):
    """Largest multiple-of-128 divisor of n_pad that is <= target."""
    t = min(target, n_pad)
    while n_pad % t != 0:
        t -= 128
    return t


def graphsage_kernel(adj_ref, xk_ref, xi_ref, invdeg_ref,
                     w_self_ref, w_nbr_ref, b_ref, o_ref, acc_ref):
    k = pl.program_id(1)

    @pl.when(k == 0)
    def _():
        acc_ref[...] = jnp.zeros_like(acc_ref)

    # Partial neighbor aggregation: (tm, tk) @ (tk, Cin), accumulated in f32.
    # Adjacency arrives as bf16 (exact 0/1) and is upcast in-VMEM, so the
    # matmul is numerically identical to an f32 adjacency.
    acc_ref[...] += jnp.dot(adj_ref[...].astype(jnp.float32), xk_ref[...],
                            preferred_element_type=jnp.float32)

    @pl.when(k == pl.num_programs(1) - 1)
    def _():
        # Mean aggregation via precomputed reciprocal degree.
        x_nbr = acc_ref[...] * invdeg_ref[...]              # (tm, Cin)
        # concat([x, x_nbr]) @ W^T + b  as the equivalent split matmul.
        out = jnp.dot(xi_ref[...], w_self_ref[...],
                      preferred_element_type=jnp.float32)
        out = out + jnp.dot(x_nbr, w_nbr_ref[...],
                            preferred_element_type=jnp.float32)
        out = out + b_ref[...]
        out = jnp.maximum(out, 0.0)                          # ReLU (is_last=False)
        # TODO(synk): training-mode dropout (scaled Bernoulli mask) not applied;
        # inference-only, matching eval() behavior.
        o_ref[...] = out.astype(o_ref.dtype)


@functools.partial(jax.jit, static_argnames=("tm_target", "tk_target"))
def graphsage_conv(adj, x, weight, bias, *, tm_target=512, tk_target=2048):
    """adj: (N, N) f32 dense adjacency (no self loops); x: (N, Cin) f32;
    weight: (Cout, 2*Cin) f32 (torch nn.Linear layout); bias: (Cout,) f32."""
    n_v, c_in = x.shape
    c_out = weight.shape[0]

    # --- glue: split the Linear weight, precompute inverse degrees (exact) ---
    w_t = weight.astype(jnp.float32).T                         # (2*Cin, Cout)
    deg = jnp.sum(adj.astype(jnp.float32), axis=-1, keepdims=True)
    inv_deg = 1.0 / jnp.maximum(deg, 1.0)                      # (N, 1)

    # --- padding: N to tile multiples, Cout to a lane-dense multiple of 128 ---
    n_pad = _round_up(n_v, 128)
    tm = _choose_tile(n_pad, tm_target)
    tk = _choose_tile(n_pad, tk_target)
    c_out_pad = _round_up(c_out, 128)

    adj_p = jnp.zeros((n_pad, n_pad), jnp.bfloat16).at[:n_v, :n_v].set(
        adj.astype(jnp.bfloat16))
    x_p = jnp.zeros((n_pad, c_in), jnp.float32).at[:n_v, :].set(
        x.astype(jnp.float32))
    inv_deg_p = jnp.zeros((n_pad, 1), jnp.float32).at[:n_v, :].set(inv_deg)
    w_self = jnp.zeros((c_in, c_out_pad), jnp.float32).at[:, :c_out].set(
        w_t[:c_in, :])
    w_nbr = jnp.zeros((c_in, c_out_pad), jnp.float32).at[:, :c_out].set(
        w_t[c_in:, :])
    b_p = jnp.zeros((1, c_out_pad), jnp.float32).at[:, :c_out].set(
        bias.astype(jnp.float32).reshape(1, c_out))

    grid = (n_pad // tm, n_pad // tk)

    # Explicit VMEM budget for the chosen tiles (double-buffered inputs/outputs
    # + in-kernel f32 upcast of the adjacency tile + accumulator + weights),
    # with 2x headroom, capped safely under v7x's 64 MiB physical VMEM.
    budget = (2 * tm * tk * 2            # adj tiles (bf16), double-buffered
              + tm * tk * 4              # f32 upcast of the adjacency tile
              + 2 * tk * c_in * 4        # x (aggregation operand)
              + 2 * tm * c_in * 4        # x (self term)
              + 2 * tm * 4               # inv_deg
              + 2 * tm * c_out_pad * 4   # output tile
              + tm * c_in * 4            # accumulator scratch
              + (2 * c_in * c_out_pad + c_out_pad) * 4)  # resident weights/bias
    vmem_limit = int(min(max(2 * budget, 32 * 1024 * 1024), 48 * 1024 * 1024))

    out_p = pl.pallas_call(
        graphsage_kernel,
        out_shape=jax.ShapeDtypeStruct((n_pad, c_out_pad), jnp.float32),
        grid_spec=pltpu.PrefetchScalarGridSpec(
            num_scalar_prefetch=0,
            grid=grid,
            in_specs=[
                pl.BlockSpec((tm, tk), lambda i, k: (i, k)),           # adj tile
                pl.BlockSpec((tk, c_in), lambda i, k: (k, 0)),         # x (agg RHS)
                pl.BlockSpec((tm, c_in), lambda i, k: (i, 0)),         # x (self)
                pl.BlockSpec((tm, 1), lambda i, k: (i, 0)),            # inv_deg
                pl.BlockSpec((c_in, c_out_pad), lambda i, k: (0, 0)),  # W_self
                pl.BlockSpec((c_in, c_out_pad), lambda i, k: (0, 0)),  # W_nbr
                pl.BlockSpec((1, c_out_pad), lambda i, k: (0, 0)),     # bias
            ],
            out_specs=pl.BlockSpec((tm, c_out_pad), lambda i, k: (i, 0)),
            scratch_shapes=[pltpu.VMEM((tm, c_in), jnp.float32)],
        ),
        compiler_params=pltpu.CompilerParams(
            dimension_semantics=("parallel", "arbitrary"),
            vmem_limit_bytes=vmem_limit,
        ),
    )(adj_p, x_p, x_p, inv_deg_p, w_self, w_nbr, b_p)

    return out_p[:n_v, :c_out]


def graphsage_ref(adj, x, weight, bias):
    deg = jnp.maximum(adj.sum(axis=-1, keepdims=True), 1.0)
    x_nbr = (adj @ x) / deg
    cat = jnp.concatenate([x, x_nbr], axis=1)
    return jnp.maximum(cat @ weight.T + bias, 0.0)


if __name__ == "__main__":
    key = jax.random.PRNGKey(0)
    n_v, c_in, c_out = 64, 16, 32

    k_adj, k_x, k_w, k_b = jax.random.split(key, 4)

    # Random undirected graph (dense adjacency, no self loops), deterministic.
    a = (jax.random.uniform(k_adj, (n_v, n_v)) < 0.1).astype(jnp.float32)
    adj = jnp.maximum(a, a.T)
    adj = adj * (1.0 - jnp.eye(n_v, dtype=jnp.float32))

    x = jax.random.normal(k_x, (n_v, c_in), dtype=jnp.float32)

    # nn.Linear(2*Cin, Cout) init: U(-1/sqrt(fan_in), 1/sqrt(fan_in))
    fan_in = 2 * c_in
    bound = 1.0 / (fan_in ** 0.5)
    weight = jax.random.uniform(
        k_w, (c_out, 2 * c_in), minval=-bound, maxval=bound, dtype=jnp.float32)
    bias = jax.random.uniform(
        k_b, (c_out,), minval=-bound, maxval=bound, dtype=jnp.float32)

    out = graphsage_conv(adj, x, weight, bias)
    jax.block_until_ready(out)

    ref = graphsage_ref(adj, x, weight, bias)
    assert out.shape == (n_v, c_out)
    assert jnp.allclose(out, ref, atol=1e-5, rtol=1e-5), "mismatch vs reference"

    print("KERNEL_OK")
</pallas_src>

<mosaic_0001>
module attributes {stable_mosaic.version = 11 : i64} {
  func.func @graphsage_kernel(%arg0: i32, %arg1: i32, %arg2: memref<128x128xbf16, #tpu.memory_space<vmem>>, %arg3: memref<128x16xf32, #tpu.memory_space<vmem>>, %arg4: memref<128x16xf32, #tpu.memory_space<vmem>>, %arg5: memref<128x1xf32, #tpu.memory_space<vmem>>, %arg6: memref<16x128xf32, #tpu.memory_space<vmem>>, %arg7: memref<16x128xf32, #tpu.memory_space<vmem>>, %arg8: memref<1x128xf32, #tpu.memory_space<vmem>>, %arg9: memref<128x128xf32, #tpu.memory_space<vmem>>, %arg10: memref<128x16xf32, #tpu.memory_space<vmem>>) attributes {dimension_semantics = [#tpu.dimension_semantics<parallel>, #tpu.dimension_semantics<arbitrary>], iteration_bounds = array<i64: 1, 1>, scalar_prefetch = 0 : i64, scratch_operands = 1 : i64, tpu.core_type = #tpu.core_type<tc>, window_params = [{transform_indices = @transform_0, window_bounds = array<i64: 128, 128>}, {transform_indices = @transform_1, window_bounds = array<i64: 128, 16>}, {transform_indices = @transform_2, window_bounds = array<i64: 128, 16>}, {transform_indices = @transform_3, window_bounds = array<i64: 128, 1>}, {pipeline_mode = #tpu.pipeline_mode<synchronous>, transform_indices = @transform_4, window_bounds = array<i64: 16, 128>}, {pipeline_mode = #tpu.pipeline_mode<synchronous>, transform_indices = @transform_5, window_bounds = array<i64: 16, 128>}, {pipeline_mode = #tpu.pipeline_mode<synchronous>, transform_indices = @transform_6, window_bounds = array<i64: 1, 128>}, {transform_indices = @transform_7, window_bounds = array<i64: 128, 128>}]} {
    %c0_i32 = arith.constant 0 : i32
    %0 = arith.cmpi eq, %arg1, %c0_i32 : i32
    %1 = arith.extui %0 : i1 to i32
    %c0_i32_0 = arith.constant 0 : i32
    %2 = arith.cmpi ne, %1, %c0_i32_0 : i32
    scf.if %2 {
      %cst_10 = arith.constant 0.000000e+00 : f32
      %13 = vector.broadcast %cst_10 : f32 to vector<128x16xf32>
      %c0_11 = arith.constant 0 : index
      %c0_12 = arith.constant 0 : index
      %14 = vector.load %arg10[%c0_11, %c0_12] : memref<128x16xf32, #tpu.memory_space<vmem>>, vector<128x16xf32>
      tpu.vector_store %arg10[%c0_11, %c0_12], %13 {strides = array<i32>} : memref<128x16xf32, #tpu.memory_space<vmem>>, vector<128x16xf32>,
    } else {
    }
    %c0 = arith.constant 0 : index
    %c0_1 = arith.constant 0 : index
    %3 = vector.load %arg10[%c0, %c0_1] : memref<128x16xf32, #tpu.memory_space<vmem>>, vector<128x16xf32>
    %c0_2 = arith.constant 0 : index
    %c0_3 = arith.constant 0 : index
    %4 = vector.load %arg2[%c0_2, %c0_3] : memref<128x128xbf16, #tpu.memory_space<vmem>>, vector<128x128xbf16>
    %5 = arith.extf %4 : vector<128x128xbf16> to vector<128x128xf32>
    %c0_4 = arith.constant 0 : index
    %c0_5 = arith.constant 0 : index
    %6 = vector.load %arg3[%c0_4, %c0_5] : memref<128x16xf32, #tpu.memory_space<vmem>>, vector<128x16xf32>
    %cst = arith.constant dense<0.000000e+00> : vector<128x16xf32>
    %7 = tpu.matmul %5, %6, %cst {dimension_numbers = #tpu.dot_dimension_numbers<[1], [0], [0], [1], [0, 0, 1, 1], [], []>} : vector<128x128xf32>, vector<128x16xf32>, vector<128x16xf32> -> vector<128x16xf32>
    %8 = arith.addf %3, %7 : vector<128x16xf32>
    %c0_6 = arith.constant 0 : index
    %c0_7 = arith.constant 0 : index
    %9 = vector.load %arg10[%c0_6, %c0_7] : memref<128x16xf32, #tpu.memory_space<vmem>>, vector<128x16xf32>
    tpu.vector_store %arg10[%c0_6, %c0_7], %8 {strides = array<i32>} : memref<128x16xf32, #tpu.memory_space<vmem>>, vector<128x16xf32>,
    %c0_i32_8 = arith.constant 0 : i32
    %10 = arith.cmpi eq, %arg1, %c0_i32_8 : i32
    %11 = arith.extui %10 : i1 to i32
    %c0_i32_9 = arith.constant 0 : i32
    %12 = arith.cmpi ne, %11, %c0_i32_9 : i32
    scf.if %12 {
      %c0_10 = arith.constant 0 : index
      %c0_11 = arith.constant 0 : index
      %13 = vector.load %arg10[%c0_10, %c0_11] : memref<128x16xf32, #tpu.memory_space<vmem>>, vector<128x16xf32>
      %c0_12 = arith.constant 0 : index
      %c0_13 = arith.constant 0 : index
      %14 = vector.load %arg5[%c0_12, %c0_13] : memref<128x1xf32, #tpu.memory_space<vmem>>, vector<128x1xf32>
      %15 = vector.broadcast %14 : vector<128x1xf32> to vector<128x16xf32>
      %16 = arith.mulf %13, %15 : vector<128x16xf32>
      %c0_14 = arith.constant 0 : index
      %c0_15 = arith.constant 0 : index
      %17 = vector.load %arg4[%c0_14, %c0_15] : memref<128x16xf32, #tpu.memory_space<vmem>>, vector<128x16xf32>
      %c0_16 = arith.constant 0 : index
      %c0_17 = arith.constant 0 : index
      %18 = vector.load %arg6[%c0_16, %c0_17] : memref<16x128xf32, #tpu.memory_space<vmem>>, vector<16x128xf32>
      %cst_18 = arith.constant dense<0.000000e+00> : vector<128x128xf32>
      %19 = tpu.matmul %17, %18, %cst_18 {dimension_numbers = #tpu.dot_dimension_numbers<[1], [0], [0], [1], [0, 0, 1, 1], [], []>} : vector<128x16xf32>, vector<16x128xf32>, vector<128x128xf32> -> vector<128x128xf32>
      %c0_19 = arith.constant 0 : index
      %c0_20 = arith.constant 0 : index
      %20 = vector.load %arg7[%c0_19, %c0_20] : memref<16x128xf32, #tpu.memory_space<vmem>>, vector<16x128xf32>
      %cst_21 = arith.constant dense<0.000000e+00> : vector<128x128xf32>
      %21 = tpu.matmul %16, %20, %cst_21 {dimension_numbers = #tpu.dot_dimension_numbers<[1], [0], [0], [1], [0, 0, 1, 1], [], []>} : vector<128x16xf32>, vector<16x128xf32>, vector<128x128xf32> -> vector<128x128xf32>
      %22 = arith.addf %19, %21 : vector<128x128xf32>
      %c0_22 = arith.constant 0 : index
      %c0_23 = arith.constant 0 : index
      %23 = vector.load %arg8[%c0_22, %c0_23] : memref<1x128xf32, #tpu.memory_space<vmem>>, vector<1x128xf32>
      %24 = vector.broadcast %23 : vector<1x128xf32> to vector<128x128xf32>
      %25 = arith.addf %22, %24 : vector<128x128xf32>
      %cst_24 = arith.constant 0.000000e+00 : f32
      %26 = vector.broadcast %cst_24 : f32 to vector<128x128xf32>
      %27 = arith.maximumf %25, %26 : vector<128x128xf32>
      %c0_25 = arith.constant 0 : index
      %c0_26 = arith.constant 0 : index
      %28 = vector.load %arg9[%c0_25, %c0_26] : memref<128x128xf32, #tpu.memory_space<vmem>>, vector<128x128xf32>
      tpu.vector_store %arg9[%c0_25, %c0_26], %27 {strides = array<i32>} : memref<128x128xf32, #tpu.memory_space<vmem>>, vector<128x128xf32>,
    } else {
    }
    return
  }
  func.func @transform_0(%arg0: i32, %arg1: i32) -> (i32, i32) {
    %c0_i32 = arith.constant 0 : i32
    return %arg0, %arg1 : i32, i32
  }
  func.func @transform_1(%arg0: i32, %arg1: i32) -> (i32, i32) {
    %c0_i32 = arith.constant 0 : i32
    %c0_i32_0 = arith.constant 0 : i32
    return %arg1, %c0_i32 : i32, i32
  }
  func.func @transform_2(%arg0: i32, %arg1: i32) -> (i32, i32) {
    %c0_i32 = arith.constant 0 : i32
    %c0_i32_0 = arith.constant 0 : i32
    return %arg0, %c0_i32 : i32, i32
  }
  func.func @transform_3(%arg0: i32, %arg1: i32) -> (i32, i32) {
    %c0_i32 = arith.constant 0 : i32
    %c0_i32_0 = arith.constant 0 : i32
    return %arg0, %c0_i32 : i32, i32
  }
  func.func @transform_4(%arg0: i32, %arg1: i32) -> (i32, i32) {
    %c0_i32 = arith.constant 0 : i32
    %c0_i32_0 = arith.constant 0 : i32
    %c0_i32_1 = arith.constant 0 : i32
    return %c0_i32, %c0_i32_0 : i32, i32
  }
  func.func @transform_5(%arg0: i32, %arg1: i32) -> (i32, i32) {
    %c0_i32 = arith.constant 0 : i32
    %c0_i32_0 = arith.constant 0 : i32
    %c0_i32_1 = arith.constant 0 : i32
    return %c0_i32, %c0_i32_0 : i32, i32
  }
  func.func @transform_6(%arg0: i32, %arg1: i32) -> (i32, i32) {
    %c0_i32 = arith.constant 0 : i32
    %c0_i32_0 = arith.constant 0 : i32
    %c0_i32_1 = arith.constant 0 : i32
    return %c0_i32, %c0_i32_0 : i32, i32
  }
  func.func @transform_7(%arg0: i32, %arg1: i32) -> (i32, i32) {
    %c0_i32 = arith.constant 0 : i32
    %c0_i32_0 = arith.constant 0 : i32
    return %arg0, %c0_i32 : i32, i32
  }
}

</mosaic_0001>

<bundles_post_ra>
// kernel: graphsage_conv.1
= control target key start
LH: loop header
LB: loop body
LE: loop exit
PB: predicated region body
PF: predicated region fallthrough
CT: control target
= control target key end

     0   :  { %v1141_v2 = vmov 0   ;;  %vm30_vm0 = vcmask 130048   ;;  %v1142_v23 = vmov 0.0   ;;  %s1512_s1 = inlined_call_operand.vmem [shape: f32[128,16], index: 1, kind: input, shape index: {}, may-alias: {1,2}]   ;;  %s1513_s0 = inlined_call_operand.vmem [shape: bf16[128,128], index: 0, kind: input, shape index: {}]   ;;  %s1514_s3 = inlined_call_operand.vmem [shape: f32[128,1], index: 3, kind: input, shape index: {}]   ;;  %s1515_s5 = inlined_call_operand.vmem [shape: f32[16,128], index: 5, kind: input, shape index: {}]   ;;  %s1516_s4 = inlined_call_operand.vmem [shape: f32[16,128], index: 4, kind: input, shape index: {}]   ;;  %s1517_s2 = inlined_call_operand.vmem [shape: f32[128,16], index: 2, kind: input, shape index: {}, may-alias: {1,2}]   ;;  %s1518_s6 = inlined_call_operand.vmem [shape: f32[1,128], index: 6, kind: input, shape index: {}]   ;;  %s1519_s7 = inlined_call_operand.vmem [shape: f32[128,128], index: 7, kind: output, shape index: {}]  }
   0x1   :  { %v110_v0 = vld [vmem:[%s1512_s1 + $0x78] sm:$0xff]  ;;  %v109_v1 = vld [vmem:[%s1512_s1 + $0x70] sm:$0xff]  ;;  %1139 = vset.pattern.permute.xlu0 %v1141_v2  ;;  %1140 = vset.pattern.permute.xlu1 %v1141_v2  ;;  %v108_v3 = vld [vmem:[%s1512_s1 + $0x68] sm:$0xff]  ;;  %32 = vst.msk [vmem:[#allocation2 + $0x8] sm:$0xff] %vm30_vm0, %v1142_v23 }
   0x2   :  { %1025 = vmatprep.subr.mxu0 %v110_v0  ;;  %v107_v4 = vld [vmem:[%s1512_s1 + $0x60] sm:$0xff]  ;;  %v106_v6 = vld [vmem:[%s1512_s1 + $0x58] sm:$0xff]  ;;  %v105_v8 = vld [vmem:[%s1512_s1 + $0x50] sm:$0xff]  ;;  %31 = vst.msk [vmem:[#allocation2] sm:$0xff] %vm30_vm0, %v1142_v23 }
   0x3   :  { %1026 = vmatpush3.msra.mxu0 %v110_v0  ;;  %v1198_v5 = vld [vmem:[%s1513_s0] sm:$0xff]   ;;  %v310_v10 = vld [vmem:[%s1514_s3 + $0x10] sm:$0xff]  ;;  %v104_v11 = vld [vmem:[%s1512_s1 + $0x48] sm:$0xff]  ;;  %33 = vst.msk [vmem:[#allocation2 + $0x10] sm:$0xff] %vm30_vm0, %v1142_v23 }
   0x4   :  { %1027 = vmatprep.subr.mxu0 %v109_v1  ;;  %v920_v7 = vunpack.c.l.bf16 %v1198_v5  ;;  %v308_v9 = vld [vmem:[%s1514_s3] sm:$0xff]  ;;  %336 = vperm.xlu1 %1140, %v310_v10   ;;  %v309_v12 = vld [vmem:[%s1514_s3 + $0x8] sm:$0xff]  ;;  %v311_v13 = vld [vmem:[%s1514_s3 + $0x18] sm:$0xff]  ;;  %34 = vst.msk [vmem:[#allocation2 + $0x18] sm:$0xff] %vm30_vm0, %v1142_v23  ;;  %v921_v33 = vunpack.c.h.bf16 %v1198_v5 }
   0x5   :  { %1028 = vmatpush3.msra.mxu0 %v109_v1  ;;  %326 = vperm.xlu0 %1139, %v308_v9   ;;  %v103_v14 = vld [vmem:[%s1512_s1 + $0x40] sm:$0xff]  ;;  %v102_v15 = vld [vmem:[%s1512_s1 + $0x38] sm:$0xff]  ;;  %v313_v17 = vld [vmem:[%s1514_s3 + $0x28] sm:$0xff]  ;;  %35 = vst.msk [vmem:[#allocation2 + $0x20] sm:$0xff] %vm30_vm0, %v1142_v23 }
   0x6   :  { %1029 = vmatprep.subr.mxu0 %v108_v3  ;;  %1057 = vmatprep.mubr.f32.mxu0 %v920_v7  ;;  %v312_v16 = vld [vmem:[%s1514_s3 + $0x20] sm:$0xff]  ;;  %v101_v18 = vld [vmem:[%s1512_s1 + $0x30] sm:$0xff]  ;;  %v100_v19 = vld [vmem:[%s1512_s1 + $0x28] sm:$0xff]  ;;  %36 = vst.msk [vmem:[#allocation2 + $0x28] sm:$0xff] %vm30_vm0, %v1142_v23 }
   0x7   :  { %1030 = vmatpush3.msra.mxu0 %v108_v3  ;;  %v314_v20 = vld [vmem:[%s1514_s3 + $0x30] sm:$0xff]  ;;  %v315_v21 = vld [vmem:[%s1514_s3 + $0x38] sm:$0xff]  ;;  %v99_v22 = vld [vmem:[%s1512_s1 + $0x20] sm:$0xff]  ;;  %37 = vst.msk [vmem:[#allocation2 + $0x30] sm:$0xff] %vm30_vm0, %v1142_v23 }
   0x8   :  { %1031 = vmatprep.subr.mxu0 %v107_v4  ;;  %341 = vperm.xlu1 %1140, %v311_v13   ;;  %38 = vst.msk [vmem:[#allocation2 + $0x38] sm:$0xff] %vm30_vm0, %v1142_v23  ;;  %39 = vst.msk [vmem:[#allocation2 + $0x40] sm:$0xff] %vm30_vm0, %v1142_v23  ;;  %v98_v24 = vld [vmem:[%s1512_s1 + $0x18] sm:$0xff]  ;;  %v316_v25 = vld [vmem:[%s1514_s3 + $0x40] sm:$0xff] }
   0x9   :  { %1032 = vmatpush3.msra.mxu0 %v107_v4  ;;  %331 = vperm.xlu0 %1139, %v309_v12   ;;  %40 = vst.msk [vmem:[#allocation2 + $0x48] sm:$0xff] %vm30_vm0, %v1142_v23  ;;  %41 = vst.msk [vmem:[#allocation2 + $0x50] sm:$0xff] %vm30_vm0, %v1142_v23  ;;  %v317_v26 = vld [vmem:[%s1514_s3 + $0x48] sm:$0xff]  ;;  %v97_v27 = vld [vmem:[%s1512_s1 + $0x10] sm:$0xff] }
   0xa   :  { %1033 = vmatprep.subr.mxu0 %v106_v6  ;;  %42 = vst.msk [vmem:[#allocation2 + $0x58] sm:$0xff] %vm30_vm0, %v1142_v23  ;;  %43 = vst.msk [vmem:[#allocation2 + $0x60] sm:$0xff] %vm30_vm0, %v1142_v23  ;;  %v96_v28 = vld [vmem:[%s1512_s1 + $0x8] sm:$0xff]  ;;  %v318_v29 = vld [vmem:[%s1514_s3 + $0x50] sm:$0xff] }
   0xb   :  { %1034 = vmatpush3.msra.mxu0 %v106_v6  ;;  %44 = vst.msk [vmem:[#allocation2 + $0x68] sm:$0xff] %vm30_vm0, %v1142_v23  ;;  %45 = vst.msk [vmem:[#allocation2 + $0x70] sm:$0xff] %vm30_vm0, %v1142_v23  ;;  %v950_v30 = vld [vmem:[%s1513_s0 + $0x8] sm:$0xff]   ;;  %v319_v31 = vld [vmem:[%s1514_s3 + $0x58] sm:$0xff] }
   0xc   :  { %1035 = vmatprep.subr.mxu0 %v105_v8  ;;  %351 = vperm.xlu1 %1140, %v313_v17   ;;  %46 = vst.msk [vmem:[#allocation2 + $0x78] sm:$0xff] %vm30_vm0, %v1142_v23  ;;  %v95_v32 = vld [vmem:[%s1512_s1] sm:$0xff]  ;;  %v924_v34 = vunpack.c.l.bf16 %v950_v30  ;;  %v951_v36 = vld [vmem:[%s1513_s0 + $0x10] sm:$0xff]   ;;  %v321_v37 = vld [vmem:[%s1514_s3 + $0x68] sm:$0xff]  ;;  %v925_v38 = vunpack.c.h.bf16 %v950_v30 }
   0xd   :  { %1036 = vmatpush3.msra.mxu0 %v105_v8  ;;  %346 = vperm.xlu0 %1139, %v312_v16   ;;  %v320_v35 = vld [vmem:[%s1514_s3 + $0x60] sm:$0xff]  ;;  %v928_v39 = vunpack.c.l.bf16 %v951_v36  ;;  %v322_v40 = vld [vmem:[%s1514_s3 + $0x70] sm:$0xff]  ;;  %v952_v41 = vld [vmem:[%s1513_s0 + $0x18] sm:$0xff]   ;;  %v929_v43 = vunpack.c.h.bf16 %v951_v36 }
   0xe   :  { %1037 = vmatprep.subr.mxu0 %v104_v11  ;;  %v323_v42 = vld [vmem:[%s1514_s3 + $0x78] sm:$0xff]  ;;  %v932_v44 = vunpack.c.l.bf16 %v952_v41  ;;  %v953_v45 = vld [vmem:[%s1513_s0 + $0x20] sm:$0xff]   ;;  %v933_v46 = vunpack.c.h.bf16 %v952_v41  ;;  %v954_v48 = vld [vmem:[%s1513_s0 + $0x28] sm:$0xff]  }
   0xf   :  { %1038 = vmatpush3.msra.mxu0 %v104_v11  ;;  %v936_v47 = vunpack.c.l.bf16 %v953_v45  ;;  %v937_v49 = vunpack.c.h.bf16 %v953_v45  ;;  %v940_v50 = vunpack.c.l.bf16 %v954_v48  ;;  %v955_v51 = vld [vmem:[%s1513_s0 + $0x30] sm:$0xff]   ;;  %v941_v52 = vunpack.c.h.bf16 %v954_v48  ;;  %v956_v54 = vld [vmem:[%s1513_s0 + $0x38] sm:$0xff]   ;;  %v439_v58 = vld [vmem:[%s1515_s5 + $0x8] sm:$0xff] }
  0x10   :  { %1039 = vmatprep.subr.mxu0 %v103_v14  ;;  %361 = vperm.xlu1 %1140, %v315_v21   ;;  %v944_v53 = vunpack.c.l.bf16 %v955_v51  ;;  %v945_v55 = vunpack.c.h.bf16 %v955_v51  ;;  %v948_v56 = vunpack.c.l.bf16 %v956_v54  ;;  %v949_v57 = vunpack.c.h.bf16 %v956_v54  ;;  %v438_v59 = vld [vmem:[%s1515_s5] sm:$0xff]  ;;  %v437_v60 = vld [vmem:[%s1516_s4 + $0x8] sm:$0xff]  ;;  %v50_v4 = vld [vmem:[#allocation2 + $0x18] sm:$0xff] }
  0x11   :  { %1040 = vmatpush3.msra.mxu0 %v103_v14  ;;  %356 = vperm.xlu0 %1139, %v314_v20   ;;  %v48_v62 = vld [vmem:[#allocation2 + $0x8] sm:$0xff]  ;;  %v47_v1 = vld [vmem:[#allocation2] sm:$0xff]  ;;  %v49_v8 = vld [vmem:[#allocation2 + $0x10] sm:$0xff] }
  0x12   :  { %1041 = vmatprep.subr.mxu0 %v102_v15  ;;  %1081 = vmatprep.subr.mxu1 %v439_v58  ;;  %v52_v12 = vld [vmem:[#allocation2 + $0x28] sm:$0xff]  ;;  %v55_v36 = vld [vmem:[#allocation2 + $0x40] sm:$0xff] }
  0x13   :  { %1042 = vmatpush3.msra.mxu0 %v102_v15  ;;  %1082 = vmatpush3.msra.mxu1 %v439_v58  ;;  %v51_v15 = vld [vmem:[#allocation2 + $0x20] sm:$0xff] }
  0x14   :  { %1043 = vmatprep.subr.mxu0 %v101_v18  ;;  %371 = vperm.xlu1 %1140, %v317_v26  }
  0x15   :  { %1044 = vmatpush3.msra.mxu0 %v101_v18  ;;  %366 = vperm.xlu0 %1139, %v316_v25  }
  0x16   :  { %1045 = vmatprep.subr.mxu0 %v100_v19  ;;  %1083 = vmatprep.subr.mxu1 %v438_v59 }
  0x17   :  { %1046 = vmatpush3.msra.mxu0 %v100_v19  ;;  %1084 = vmatpush3.msra.mxu1 %v438_v59  ;;  %v54_v19 = vld [vmem:[#allocation2 + $0x38] sm:$0xff]  ;;  %v59_v59 = vld [vmem:[#allocation2 + $0x60] sm:$0xff] }
  0x18   :  { %1047 = vmatprep.subr.mxu0 %v99_v22  ;;  %381 = vperm.xlu1 %1140, %v319_v31  }
  0x19   :  { %1048 = vmatpush3.msra.mxu0 %v99_v22  ;;  %376 = vperm.xlu0 %1139, %v318_v29   ;;  %v56_v29 = vld [vmem:[#allocation2 + $0x48] sm:$0xff] }
  0x1a   :  { %1049 = vmatprep.subr.mxu0 %v98_v24  ;;  %1109 = vmatprep.subr.mxu1 %v437_v60 }
  0x1b   :  { %1050 = vmatpush3.msra.mxu0 %v98_v24  ;;  %v53_v24 = vld [vmem:[#allocation2 + $0x30] sm:$0xff] }
  0x1c   :  { %1051 = vmatprep.subr.mxu0 %v97_v27  ;;  %391 = vperm.xlu1 %1140, %v321_v37  }
  0x1d   :  { %1052 = vmatpush3.msra.mxu0 %v97_v27  ;;  %386 = vperm.xlu0 %1139, %v320_v35  }
  0x1e   :  { %1053 = vmatprep.subr.mxu0 %v96_v28 }
  0x1f   :  { %1054 = vmatpush3.msra.mxu0 %v96_v28 }
  0x20   :  { %1055 = vmatprep.subr.mxu0 %v95_v32  ;;  %401 = vperm.xlu1 %1140, %v323_v42   ;;  %v58_v42 = vld [vmem:[#allocation2 + $0x58] sm:$0xff] }
  0x21   :  { %1056 = vmatpush3.msra.mxu0 %v95_v32  ;;  %396 = vperm.xlu0 %1139, %v322_v40  }
  0x22   :  { %1058 = vmatmul.mubr.f32.vlgmr.msra.gmra.mxu0 %v921_v33  ;;  %v436_v33 = vld [vmem:[%s1516_s4] sm:$0xff] }
  0x23   :  { %1060 = vmatprep.mubr.f32.mxu0 %v924_v34 }
  0x26   :  { %1061 = vmatmul.mubr.f32.gmra.mxu0 %v925_v38 }
  0x27   :  { %1063 = vmatprep.mubr.f32.mxu0 %v928_v39 }
  0x2a   :  { %1064 = vmatmul.mubr.f32.gmra.mxu0 %v929_v43 }
  0x2b   :  { %1066 = vmatprep.mubr.f32.mxu0 %v932_v44 }
  0x2e   :  { %1067 = vmatmul.mubr.f32.gmra.mxu0 %v933_v46 }
  0x2f   :  { %1069 = vmatprep.mubr.f32.mxu0 %v936_v47  ;;  %v57_v47 = vld [vmem:[#allocation2 + $0x50] sm:$0xff] }
  0x32   :  { %1070 = vmatmul.mubr.f32.gmra.mxu0 %v937_v49 }
  0x33   :  { %1072 = vmatprep.mubr.f32.mxu0 %v940_v50 }
  0x36   :  { %1073 = vmatmul.mubr.f32.gmra.mxu0 %v941_v52 }
  0x37   :  { %1075 = vmatprep.mubr.f32.mxu0 %v944_v53  ;;  %v60_v53 = vld [vmem:[#allocation2 + $0x68] sm:$0xff] }
  0x3a   :  { %1076 = vmatmul.mubr.f32.gmra.mxu0 %v945_v55 }
  0x3b   :  { %1078 = vmatprep.mubr.f32.mxu0 %v948_v56 }
  0x3e   :  { %1079 = vmatmul.mubr.f32.gmra.mxu0 %v949_v57 }
  0x7f   :  { %v337_v63 = vpop.permute.xlu1 %336 }
  0x80   :  { %v327_v61 = vpop.permute.xlu0 %326 }
  0x83   :  { %v342_v9 = vpop.permute.xlu1 %341 }
  0x84   :  { %v332_v6 = vpop.permute.xlu0 %331 }
  0x87   :  { %v352_v20 = vpop.permute.xlu1 %351 }
  0x88   :  { %v347_v17 = vpop.permute.xlu0 %346 }
  0x8b   :  { %v362_v38 = vpop.permute.xlu1 %361 }
  0x8c   :  { %v357_v34 = vpop.permute.xlu0 %356 }
  0x8f   :  { %v372_v55 = vpop.permute.xlu1 %371 }
  0x90   :  { %v367_v51 = vpop.permute.xlu0 %366 }
  0xe2   :  { %v1059_v0 = vpop.f32.mrf.mxu0 }
  0xe3   :  { %v257_v2 = vadd.f32 %v1059_v0, %v48_v62  ;;  %v62_v0 = vld [vmem:[#allocation2 + $0x78] sm:$0xff] }
  0xe4   :  { %v177_v3 = vpop.f32.mrf.mxu0 }
  0xe5   :  { %274 = vst.msk [vmem:[#allocation2 + $0x8] sm:$0xff] %vm30_vm0, %v257_v2  ;;  %v256_v5 = vadd.f32 %v177_v3, %v47_v1 }
  0xe6   :  { %v1062_v7 = vpop.f32.mrf.mxu0 }
  0xe7   :  { %273 = vst.msk [vmem:[#allocation2] sm:$0xff] %vm30_vm0, %v256_v5  ;;  %v259_v10 = vadd.f32 %v1062_v7, %v50_v4  ;;  %v377_v4 = vpop.permute.xlu0 %376 }
  0xe8   :  { %v187_v11 = vpop.f32.mrf.mxu0 }
  0xe9   :  { %276 = vst.msk [vmem:[#allocation2 + $0x18] sm:$0xff] %vm30_vm0, %v259_v10  ;;  %v258_v13 = vadd.f32 %v187_v11, %v49_v8  ;;  %v382_v8 = vpop.permute.xlu1 %381 }
  0xea   :  { %v1065_v14 = vpop.f32.mrf.mxu0 }
  0xeb   :  { %275 = vst.msk [vmem:[#allocation2 + $0x10] sm:$0xff] %vm30_vm0, %v258_v13  ;;  %v261_v16 = vadd.f32 %v1065_v14, %v52_v12 }
  0xec   :  { %v197_v18 = vpop.f32.mrf.mxu0  ;;  %v293_v22 = vld [vmem:[#allocation2 + $0x8] sm:$0xff] }
  0xed   :  { %278 = vst.msk [vmem:[#allocation2 + $0x28] sm:$0xff] %vm30_vm0, %v261_v16  ;;  %v260_v21 = vadd.f32 %v197_v18, %v51_v15  ;;  %v405_v30 = vmul.f32 %v332_v6, %v293_v22  ;;  %v61_v6 = vld [vmem:[#allocation2 + $0x70] sm:$0xff] }
  0xee   :  { %v1068_v23 = vpop.f32.mrf.mxu0  ;;  %v292_v25 = vld [vmem:[#allocation2] sm:$0xff] }
  0xef   :  { %277 = vst.msk [vmem:[#allocation2 + $0x20] sm:$0xff] %vm30_vm0, %v260_v21  ;;  %v263_v26 = vadd.f32 %v1068_v23, %v54_v19  ;;  %v404_v27 = vmul.f32 %v327_v61, %v292_v25  ;;  %v392_v19 = vpop.permute.xlu1 %391 }
  0xf0   :  { %v207_v28 = vpop.f32.mrf.mxu0  ;;  %v295_v32 = vld [vmem:[#allocation2 + $0x18] sm:$0xff] }
  0xf1   :  { %280 = vst.msk [vmem:[#allocation2 + $0x38] sm:$0xff] %vm30_vm0, %v263_v26  ;;  %v262_v31 = vadd.f32 %v207_v28, %v53_v24  ;;  %1085 = vmatprep.mubr.msk.f32.mxu1 %vm30_vm0, %v404_v27  ;;  %v407_v43 = vmul.f32 %v342_v9, %v295_v32  ;;  %v422_v32 = vld [vmem:[%s1517_s2 + $0x10] sm:$0xff] }
  0xf2   :  { %v1071_v35 = vpop.f32.mrf.mxu0  ;;  %1086 = vmatmul.mubr.msk.f32.vlgmr.msra.gmra.mxu1 %vm30_vm0, %v405_v30  ;;  %v294_v37 = vld [vmem:[#allocation2 + $0x10] sm:$0xff]  ;;  %v420_v30 = vld [vmem:[%s1517_s2] sm:$0xff] }
  0xf3   :  { %279 = vst.msk [vmem:[#allocation2 + $0x30] sm:$0xff] %vm30_vm0, %v262_v31  ;;  %v265_v39 = vadd.f32 %v1071_v35, %v56_v29  ;;  %1110 = vmatpush3.msra.mxu1 %v437_v60  ;;  %v406_v40 = vmul.f32 %v337_v63, %v294_v37  ;;  %v402_v27 = vpop.permute.xlu1 %401  ;;  %v421_v31 = vld [vmem:[%s1517_s2 + $0x8] sm:$0xff]  ;;  %v427_v37 = vld [vmem:[%s1517_s2 + $0x38] sm:$0xff] }
  0xf4   :  { %v217_v41 = vpop.f32.mrf.mxu0  ;;  %1111 = vmatprep.subr.mxu1 %v436_v33  ;;  %v297_v45 = vld [vmem:[#allocation2 + $0x28] sm:$0xff] }
  0xf5   :  { %282 = vst.msk [vmem:[#allocation2 + $0x48] sm:$0xff] %vm30_vm0, %v265_v39  ;;  %v264_v44 = vadd.f32 %v217_v41, %v55_v36  ;;  %1088 = vmatprep.mubr.msk.f32.mxu1 %vm30_vm0, %v406_v40  ;;  %1112 = vmatpush3.msra.mxu1 %v436_v33  ;;  %v409_v54 = vmul.f32 %v352_v20, %v297_v45  ;;  %v423_v33 = vld [vmem:[%s1517_s2 + $0x18] sm:$0xff]  ;;  %v425_v35 = vld [vmem:[%s1517_s2 + $0x28] sm:$0xff]  ;;  %v426_v36 = vld [vmem:[%s1517_s2 + $0x30] sm:$0xff] }
  0xf6   :  { %v1074_v46 = vpop.f32.mrf.mxu0  ;;  %1089 = vmatmul.mubr.msk.f32.gmra.mxu1 %vm30_vm0, %v407_v43  ;;  %v296_v48 = vld [vmem:[#allocation2 + $0x20] sm:$0xff]  ;;  %v429_v39 = vld [vmem:[%s1517_s2 + $0x48] sm:$0xff]  ;;  %v430_v40 = vld [vmem:[%s1517_s2 + $0x50] sm:$0xff] }
  0xf7   :  { %281 = vst.msk [vmem:[#allocation2 + $0x40] sm:$0xff] %vm30_vm0, %v264_v44  ;;  %v267_v49 = vadd.f32 %v1074_v46, %v58_v42  ;;  %v408_v50 = vmul.f32 %v347_v17, %v296_v48  ;;  %v387_v17 = vpop.permute.xlu0 %386  ;;  %v431_v41 = vld [vmem:[%s1517_s2 + $0x58] sm:$0xff]  ;;  %v432_v42 = vld [vmem:[%s1517_s2 + $0x60] sm:$0xff]  ;;  %v433_v43 = vld [vmem:[%s1517_s2 + $0x68] sm:$0xff] }
  0xf8   :  { %v227_v52 = vpop.f32.mrf.mxu0  ;;  %v299_v57 = vld [vmem:[#allocation2 + $0x38] sm:$0xff]  ;;  %v434_v44 = vld [vmem:[%s1517_s2 + $0x70] sm:$0xff] }
  0xf9   :  { %284 = vst.msk [vmem:[#allocation2 + $0x58] sm:$0xff] %vm30_vm0, %v267_v49  ;;  %v266_v56 = vadd.f32 %v227_v52, %v57_v47  ;;  %1091 = vmatprep.mubr.msk.f32.mxu1 %vm30_vm0, %v408_v50  ;;  %v411_v1 = vmul.f32 %v362_v38, %v299_v57  ;;  %v428_v38 = vld [vmem:[%s1517_s2 + $0x40] sm:$0xff]  ;;  %v435_v45 = vld [vmem:[%s1517_s2 + $0x78] sm:$0xff] }
  0xfa   :  { %v1077_v58 = vpop.f32.mrf.mxu0  ;;  %1092 = vmatmul.mubr.msk.f32.gmra.mxu1 %vm30_vm0, %v409_v54  ;;  %v298_v60 = vld [vmem:[#allocation2 + $0x30] sm:$0xff] }
  0xfb   :  { %283 = vst.msk [vmem:[#allocation2 + $0x50] sm:$0xff] %vm30_vm0, %v266_v56  ;;  %v269_v61 = vadd.f32 %v1077_v58, %v60_v53  ;;  %v410_v62 = vmul.f32 %v357_v34, %v298_v60  ;;  %v397_v25 = vpop.permute.xlu0 %396  ;;  %v424_v34 = vld [vmem:[%s1517_s2 + $0x20] sm:$0xff] }
  0xfc   :  { %v237_v63 = vpop.f32.mrf.mxu0  ;;  %v301_v3 = vld [vmem:[#allocation2 + $0x48] sm:$0xff] }
  0xfd   :  { %286 = vst.msk [vmem:[#allocation2 + $0x68] sm:$0xff] %vm30_vm0, %v269_v61  ;;  %v268_v2 = vadd.f32 %v237_v63, %v59_v59  ;;  %1094 = vmatprep.mubr.msk.f32.mxu1 %vm30_vm0, %v410_v62  ;;  %v413_v12 = vmul.f32 %v372_v55, %v301_v3  ;;  %v1442_v63 = vld [vmem:[%s1518_s6] ss:$0 sm:$0xff] }
  0xfe   :  { %v1080_v5 = vpop.f32.mrf.mxu0  ;;  %1095 = vmatmul.mubr.msk.f32.gmra.mxu1 %vm30_vm0, %v411_v1  ;;  %v300_v7 = vld [vmem:[#allocation2 + $0x40] sm:$0xff] }
  0xff   :  { %285 = vst.msk [vmem:[#allocation2 + $0x60] sm:$0xff] %vm30_vm0, %v268_v2  ;;  %v271_v9 = vadd.f32 %v1080_v5, %v62_v0  ;;  %v412_v10 = vmul.f32 %v367_v51, %v300_v7 }
 0x100   :  { %v247_v11 = vpop.f32.mrf.mxu0  ;;  %v303_v14 = vld [vmem:[#allocation2 + $0x58] sm:$0xff] }
 0x101   :  { %288 = vst.msk [vmem:[#allocation2 + $0x78] sm:$0xff] %vm30_vm0, %v271_v9  ;;  %v270_v13 = vadd.f32 %v247_v11, %v61_v6  ;;  %1097 = vmatprep.mubr.msk.f32.mxu1 %vm30_vm0, %v412_v10  ;;  %v415_v18 = vmul.f32 %v382_v8, %v303_v14 }
 0x102   :  { %1098 = vmatmul.mubr.msk.f32.gmra.mxu1 %vm30_vm0, %v413_v12  ;;  %v302_v15 = vld [vmem:[#allocation2 + $0x50] sm:$0xff] }
 0x103   :  { %287 = vst.msk [vmem:[#allocation2 + $0x70] sm:$0xff] %vm30_vm0, %v270_v13  ;;  %v414_v16 = vmul.f32 %v377_v4, %v302_v15 }
 0x104   :  { %v305_v20 = vld [vmem:[#allocation2 + $0x68] sm:$0xff] }
 0x105   :  { %1100 = vmatprep.mubr.msk.f32.mxu1 %vm30_vm0, %v414_v16  ;;  %v417_v23 = vmul.f32 %v392_v19, %v305_v20 }
 0x106   :  { %1101 = vmatmul.mubr.msk.f32.gmra.mxu1 %vm30_vm0, %v415_v18  ;;  %v304_v21 = vld [vmem:[#allocation2 + $0x60] sm:$0xff] }
 0x107   :  { %v416_v22 = vmul.f32 %v387_v17, %v304_v21 }
 0x108   :  { %v307_v24 = vld [vmem:[#allocation2 + $0x78] sm:$0xff] }
 0x109   :  { %1103 = vmatprep.mubr.msk.f32.mxu1 %vm30_vm0, %v416_v22  ;;  %v419_v29 = vmul.f32 %v402_v27, %v307_v24 }
 0x10a   :  { %1104 = vmatmul.mubr.msk.f32.gmra.mxu1 %vm30_vm0, %v417_v23  ;;  %v306_v26 = vld [vmem:[#allocation2 + $0x70] sm:$0xff] }
 0x10b   :  { %v418_v28 = vmul.f32 %v397_v25, %v306_v26 }
 0x10d   :  { %1106 = vmatprep.mubr.msk.f32.mxu1 %vm30_vm0, %v418_v28 }
 0x10e   :  { %1107 = vmatmul.mubr.msk.f32.gmra.mxu1 %vm30_vm0, %v419_v29 }
 0x10f   :  { %1113 = vmatprep.mubr.msk.f32.mxu1 %vm30_vm0, %v420_v30 }
 0x112   :  { %1114 = vmatmul.mubr.msk.f32.vlgmr.msra.gmra.mxu1 %vm30_vm0, %v421_v31 }
 0x113   :  { %1116 = vmatprep.mubr.msk.f32.mxu1 %vm30_vm0, %v422_v32 }
 0x116   :  { %1117 = vmatmul.mubr.msk.f32.gmra.mxu1 %vm30_vm0, %v423_v33 }
 0x117   :  { %1119 = vmatprep.mubr.msk.f32.mxu1 %vm30_vm0, %v424_v34 }
 0x11a   :  { %1120 = vmatmul.mubr.msk.f32.gmra.mxu1 %vm30_vm0, %v425_v35 }
 0x11b   :  { %1122 = vmatprep.mubr.msk.f32.mxu1 %vm30_vm0, %v426_v36 }
 0x11e   :  { %1123 = vmatmul.mubr.msk.f32.gmra.mxu1 %vm30_vm0, %v427_v37 }
 0x11f   :  { %1125 = vmatprep.mubr.msk.f32.mxu1 %vm30_vm0, %v428_v38 }
 0x122   :  { %1126 = vmatmul.mubr.msk.f32.gmra.mxu1 %vm30_vm0, %v429_v39 }
 0x123   :  { %1128 = vmatprep.mubr.msk.f32.mxu1 %vm30_vm0, %v430_v40 }
 0x126   :  { %1129 = vmatmul.mubr.msk.f32.gmra.mxu1 %vm30_vm0, %v431_v41 }
 0x127   :  { %1131 = vmatprep.mubr.msk.f32.mxu1 %vm30_vm0, %v432_v42 }
 0x12a   :  { %1132 = vmatmul.mubr.msk.f32.gmra.mxu1 %vm30_vm0, %v433_v43 }
 0x12b   :  { %1134 = vmatprep.mubr.msk.f32.mxu1 %vm30_vm0, %v434_v44 }
 0x12e   :  { %1135 = vmatmul.mubr.msk.f32.gmra.mxu1 %vm30_vm0, %v435_v45 }
 0x1b2   :  { %v1087_v46 = vpop.f32.mrf.mxu1 }
 0x1b4   :  { %v554_v47 = vpop.f32.mrf.mxu1 }
 0x1b6   :  { %v1090_v48 = vpop.f32.mrf.mxu1 }
 0x1b8   :  { %v564_v49 = vpop.f32.mrf.mxu1 }
 0x1ba   :  { %v1093_v50 = vpop.f32.mrf.mxu1 }
 0x1bc   :  { %v574_v51 = vpop.f32.mrf.mxu1 }
 0x1be   :  { %v1096_v52 = vpop.f32.mrf.mxu1 }
 0x1c0   :  { %v584_v53 = vpop.f32.mrf.mxu1 }
 0x1c2   :  { %v1099_v54 = vpop.f32.mrf.mxu1 }
 0x1c4   :  { %v594_v55 = vpop.f32.mrf.mxu1 }
 0x1c6   :  { %v1102_v56 = vpop.f32.mrf.mxu1 }
 0x1c8   :  { %v604_v57 = vpop.f32.mrf.mxu1 }
 0x1ca   :  { %v1431_v58 = vpop.f32.mrf.mxu1 }
 0x1cc   :  { %v1433_v59 = vpop.f32.mrf.mxu1 }
 0x1ce   :  { %v1435_v60 = vpop.f32.mrf.mxu1 }
 0x1d0   :  { %v1437_v61 = vpop.f32.mrf.mxu1 }
 0x1d2   :  { %v1115_v62 = vpop.f32.mrf.mxu1 }
 0x1d3   :  { %v753_v0 = vadd.f32 %v1115_v62, %v1087_v46 }
 0x1d4   :  { %v747_v1 = vpop.f32.mrf.mxu1 }
 0x1d5   :  { %v834_v2 = vadd.f32 %v1442_v63, %v753_v0  ;;  %v748_v3 = vadd.f32 %v747_v1, %v554_v47 }
 0x1d6   :  { %v1118_v4 = vpop.f32.mrf.mxu1 }
 0x1d7   :  { %v850_v5 = vmax.f32 %v834_v2, 0.0  ;;  %v833_v6 = vadd.f32 %v1442_v63, %v748_v3  ;;  %v763_v7 = vadd.f32 %v1118_v4, %v1090_v48 }
 0x1d8   :  { %v757_v8 = vpop.f32.mrf.mxu1 }
 0x1d9   :  { %866 = vst [vmem:[%s1519_s7 + $0x8] sm:$0xff] %v850_v5  ;;  %v849_v9 = vmax.f32 %v833_v6, 0.0  ;;  %v836_v10 = vadd.f32 %v1442_v63, %v763_v7  ;;  %v758_v11 = vadd.f32 %v757_v8, %v564_v49 }
 0x1da   :  { %v1121_v12 = vpop.f32.mrf.mxu1 }
 0x1db   :  { %865 = vst [vmem:[%s1519_s7] sm:$0xff] %v849_v9  ;;  %v852_v13 = vmax.f32 %v836_v10, 0.0  ;;  %v835_v14 = vadd.f32 %v1442_v63, %v758_v11  ;;  %v773_v15 = vadd.f32 %v1121_v12, %v1093_v50 }
 0x1dc   :  { %v767_v16 = vpop.f32.mrf.mxu1 }
 0x1dd   :  { %868 = vst [vmem:[%s1519_s7 + $0x18] sm:$0xff] %v852_v13  ;;  %v851_v17 = vmax.f32 %v835_v14, 0.0  ;;  %v838_v18 = vadd.f32 %v1442_v63, %v773_v15  ;;  %v768_v19 = vadd.f32 %v767_v16, %v574_v51 }
 0x1de   :  { %v1124_v20 = vpop.f32.mrf.mxu1 }
 0x1df   :  { %867 = vst [vmem:[%s1519_s7 + $0x10] sm:$0xff] %v851_v17  ;;  %v854_v21 = vmax.f32 %v838_v18, 0.0  ;;  %v837_v22 = vadd.f32 %v1442_v63, %v768_v19  ;;  %v783_v23 = vadd.f32 %v1124_v20, %v1096_v52 }
 0x1e0   :  { %v777_v24 = vpop.f32.mrf.mxu1 }
 0x1e1   :  { %870 = vst [vmem:[%s1519_s7 + $0x28] sm:$0xff] %v854_v21  ;;  %v853_v25 = vmax.f32 %v837_v22, 0.0  ;;  %v840_v26 = vadd.f32 %v1442_v63, %v783_v23  ;;  %v778_v27 = vadd.f32 %v777_v24, %v584_v53 }
 0x1e2   :  { %v1127_v28 = vpop.f32.mrf.mxu1 }
 0x1e3   :  { %869 = vst [vmem:[%s1519_s7 + $0x20] sm:$0xff] %v853_v25  ;;  %v856_v29 = vmax.f32 %v840_v26, 0.0  ;;  %v839_v30 = vadd.f32 %v1442_v63, %v778_v27  ;;  %v793_v31 = vadd.f32 %v1127_v28, %v1099_v54 }
 0x1e4   :  { %v787_v32 = vpop.f32.mrf.mxu1 }
 0x1e5   :  { %872 = vst [vmem:[%s1519_s7 + $0x38] sm:$0xff] %v856_v29  ;;  %v855_v33 = vmax.f32 %v839_v30, 0.0  ;;  %v842_v34 = vadd.f32 %v1442_v63, %v793_v31  ;;  %v788_v35 = vadd.f32 %v787_v32, %v594_v55 }
 0x1e6   :  { %v1130_v36 = vpop.f32.mrf.mxu1 }
 0x1e7   :  { %871 = vst [vmem:[%s1519_s7 + $0x30] sm:$0xff] %v855_v33  ;;  %v858_v37 = vmax.f32 %v842_v34, 0.0  ;;  %v841_v38 = vadd.f32 %v1442_v63, %v788_v35  ;;  %v803_v39 = vadd.f32 %v1130_v36, %v1102_v56 }
 0x1e8   :  { %v797_v40 = vpop.f32.mrf.mxu1 }
 0x1e9   :  { %874 = vst [vmem:[%s1519_s7 + $0x48] sm:$0xff] %v858_v37  ;;  %v857_v41 = vmax.f32 %v841_v38, 0.0  ;;  %v844_v42 = vadd.f32 %v1442_v63, %v803_v39  ;;  %v798_v43 = vadd.f32 %v797_v40, %v604_v57 }
 0x1ea   :  { %v1133_v44 = vpop.f32.mrf.mxu1 }
 0x1eb   :  { %873 = vst [vmem:[%s1519_s7 + $0x40] sm:$0xff] %v857_v41  ;;  %v860_v45 = vmax.f32 %v844_v42, 0.0  ;;  %v843_v46 = vadd.f32 %v1442_v63, %v798_v43  ;;  %v813_v47 = vadd.f32 %v1133_v44, %v1431_v58 }
 0x1ec   :  { %v807_v48 = vpop.f32.mrf.mxu1 }
 0x1ed   :  { %876 = vst [vmem:[%s1519_s7 + $0x58] sm:$0xff] %v860_v45  ;;  %v859_v49 = vmax.f32 %v843_v46, 0.0  ;;  %v846_v50 = vadd.f32 %v1442_v63, %v813_v47  ;;  %v808_v51 = vadd.f32 %v807_v48, %v1433_v59 }
 0x1ee   :  { %v1136_v52 = vpop.f32.mrf.mxu1 }
 0x1ef   :  { %875 = vst [vmem:[%s1519_s7 + $0x50] sm:$0xff] %v859_v49  ;;  %v862_v53 = vmax.f32 %v846_v50, 0.0  ;;  %v845_v54 = vadd.f32 %v1442_v63, %v808_v51  ;;  %v823_v55 = vadd.f32 %v1136_v52, %v1435_v60 }
 0x1f0   :  { %v817_v56 = vpop.f32.mrf.mxu1 }
 0x1f1   :  { %878 = vst [vmem:[%s1519_s7 + $0x68] sm:$0xff] %v862_v53  ;;  %v861_v57 = vmax.f32 %v845_v54, 0.0  ;;  %v848_v58 = vadd.f32 %v1442_v63, %v823_v55  ;;  %v818_v59 = vadd.f32 %v817_v56, %v1437_v61 }
 0x1f3   :  { %877 = vst [vmem:[%s1519_s7 + $0x60] sm:$0xff] %v861_v57  ;;  %v864_v62 = vmax.f32 %v848_v58, 0.0  ;;  %v847_v0 = vadd.f32 %v1442_v63, %v818_v59 }
 0x1f5   :  { %880 = vst [vmem:[%s1519_s7 + $0x78] sm:$0xff] %v864_v62  ;;  %v863_v60 = vmax.f32 %v847_v0, 0.0 }
 0x1f7   :  { %879 = vst [vmem:[%s1519_s7 + $0x70] sm:$0xff] %v863_v60 }

</bundles_post_ra>
